<compile_context>
chip_gen: v5e
topology: v5e:2x2
jax: 0.10.0
libtpu: 0.0.40
codegen_flags: <defaults>
</compile_context>

<pallas_src>
import jax
import jax.numpy as jnp
from jax.experimental import pallas as pl
from jax.experimental.pallas import tpu as pltpu


def exam_kernel(region_ref, context_ref, mask_ref,
                w0t_ref, b0_ref, w1_ref, b1_ref, w2r_ref, b2_ref,
                out_ref):
    TB, S, E = region_ref.shape
    _, L, R, _ = context_ref.shape
    C = w0t_ref.shape[0]
    C_pad = out_ref.shape[1]

    # upcast once; keep all arithmetic in f32 (v5e VPU has no bf16 ALU)
    region = region_ref[...].astype(jnp.float32)       # (TB, S, E)
    context = context_ref[...]                         # (TB, L, R, E) bf16
    mask = mask_ref[...]                               # (TB, L) f32

    # region-window projection + AdaptiveAvgPool1d(1) over the region axis.
    # The windowed region tensor (B,L,R,E) never touches HBM: it is rebuilt
    # here from the per-token embeddings with R static slices.
    feat = jnp.zeros((TB, L, E), jnp.float32)
    for r in range(R):                                  # static unroll, R small
        feat = feat + region[:, r:r + L, :] * context[:, :, r, :].astype(jnp.float32)
    feat = feat * (mask[:, :, None] * (1.0 / R))        # masked mean over R

    # dense0 on the VPU (C tiny -> MXU would be <5% utilised), producing g
    # directly in (C, TB, L) layout: the big dims stay in sublane/lane and the
    # reference's (B,L,C)->(B,C,L) transpose disappears entirely.
    w0t = w0t_ref[...]                                  # (C, E)
    g_rows = []
    for c in range(C):                                  # static unroll
        g_rows.append(jnp.sum(feat * w0t[c, :], axis=-1))   # (TB, L)
    g = jnp.stack(g_rows, axis=0) + b0_ref[...][:, :, None]  # (C, TB, L)

    residual = jnp.sum(g, axis=2)                       # (C, TB)

    # dense1 on the MXU, relu, dense2 (N=1) as broadcast-mul + lane reduce.
    g2 = g.reshape(C * TB, L)                           # C*TB multiple of 8
    h = jnp.dot(g2, w1_ref[...], preferred_element_type=jnp.float32) + b1_ref[...]
    h = jnp.maximum(h, 0.0)                             # (C*TB, H1)
    res = jnp.sum(h * w2r_ref[...], axis=-1, keepdims=True)   # (C*TB, 1)
    res = res.reshape(C, TB) + b2_ref[...]              # (C, TB)

    out = (res + residual).T                            # (TB, C) tiny transpose

    # log_softmax over classes
    m = jnp.max(out, axis=1, keepdims=True)
    s = out - m
    lse = jnp.log(jnp.sum(jnp.exp(s), axis=1, keepdims=True))
    logp = s - lse                                      # (TB, C)

    # lane-dense, unmasked store: pad the class dim to C_pad (multiple of 128)
    if C_pad > C:
        logp = jnp.concatenate(
            [logp, jnp.zeros((TB, C_pad - C), jnp.float32)], axis=-1)
    out_ref[...] = logp


def exam_forward(x, params, *, num_classes, embedding_size, region_size,
                 max_sent_len):
    B, S = x.shape
    assert S == max_sent_len
    R, E, C = region_size, embedding_size, num_classes
    rr = R // 2
    L = S - 2 * rr
    H1 = params["w1"].shape[1]
    C_pad = max(128, -(-C // 128) * 128)     # lane-dense output width

    # ---- glue gathers (XLA). Only per-token region embeddings (B,S,E) are
    # materialized (no R-fold duplication); big tensors shipped as bf16.
    # TODO(synk): for very large vocabularies, move these gathers in-kernel via
    # scalar-prefetched token ids + manual DMA gather to kill the HBM round trip.
    trimed = x[:, rr:S - rr]                                             # (B, L)
    region_tok = jnp.take(params["emb_region"], x, axis=0).astype(jnp.bfloat16)   # (B,S,E)
    context = jnp.take(params["emb"], trimed, axis=0).reshape(B, L, R, E)
    context = context.astype(jnp.bfloat16)                               # (B,L,R,E)
    mask = (trimed > 0).astype(jnp.float32)                              # (B, L)

    # kernel-friendly weight layouts (all tiny, prepared once)
    w0t = params["w0"].T                       # (C, E)
    b0c = params["b0"].reshape(C, 1)           # (C, 1)
    w1 = params["w1"]                          # (L, H1)
    b1 = params["b1"].reshape(1, H1)           # (1, H1)
    w2r = params["w2"].reshape(1, H1)          # (1, H1)
    b2 = params["b2"].reshape(1, 1)            # (1, 1)

    # batch tile: biggest tile that keeps the double-buffered bf16 inputs well
    # inside v7x's 64 MiB VMEM; multiple of 8 so 2-D sublane blocks stay legal.
    per_b = (S * E + L * R * E) * 2            # bf16 bytes per batch row
    TB = max(1, (4 * 1024 * 1024) // max(per_b, 1))
    if B <= 8:
        TB = B
    else:
        TB = min(TB, B)
        TB = max(8, (TB // 8) * 8)
    grid = (pl.cdiv(B, TB),)

    cost = pl.CostEstimate(
        flops=int(2 * B * L * E * (R + C) + 2 * B * C * H1 * (L + 1)),
        transcendentals=int(B * (C + 1)),
        bytes_accessed=int(B * S * E * 2 + B * L * R * E * 2 + B * L * 4
                           + (w0t.size + b0c.size + w1.size + b1.size
                              + w2r.size + b2.size) * 4
                           + B * C_pad * 4),
    )

    out = pl.pallas_call(
        exam_kernel,
        out_shape=jax.ShapeDtypeStruct((B, C_pad), jnp.float32),
        grid=grid,
        in_specs=[
            pl.BlockSpec((TB, S, E), lambda i: (i, 0, 0)),        # region tokens
            pl.BlockSpec((TB, L, R, E), lambda i: (i, 0, 0, 0)),  # context units
            pl.BlockSpec((TB, L), lambda i: (i, 0)),              # mask
            pl.BlockSpec((C, E), lambda i: (0, 0)),               # w0^T
            pl.BlockSpec((C, 1), lambda i: (0, 0)),               # b0
            pl.BlockSpec((L, H1), lambda i: (0, 0)),              # w1
            pl.BlockSpec((1, H1), lambda i: (0, 0)),              # b1
            pl.BlockSpec((1, H1), lambda i: (0, 0)),              # w2 row
            pl.BlockSpec((1, 1), lambda i: (0, 0)),               # b2
        ],
        out_specs=pl.BlockSpec((TB, C_pad), lambda i: (i, 0)),
        compiler_params=pltpu.CompilerParams(
            dimension_semantics=("parallel",),
            vmem_limit_bytes=32 * 1024 * 1024),
        cost_estimate=cost,
    )(region_tok, context, mask, w0t, b0c, w1, b1, w2r, b2)

    return out[:, :C]


def exam_reference(x, params, *, num_classes, embedding_size, region_size,
                   max_sent_len):
    """Pure-JAX reference mirroring the PyTorch forward (same bf16 embedding
    quantization as the kernel wrapper, f32 math, highest-precision matmuls)."""
    B = x.shape[0]
    R, E, C = region_size, embedding_size, num_classes
    rr = R // 2
    S = max_sent_len
    L = S - 2 * rr
    trimed = x[:, rr:S - rr]
    win = jnp.arange(L)[:, None] + jnp.arange(R)[None, :]
    aligned = x[:, win]
    re = params["emb_region"][aligned].astype(jnp.bfloat16).astype(jnp.float32)
    ce = params["emb"][trimed].reshape(B, L, R, E).astype(jnp.bfloat16).astype(jnp.float32)
    feat = jnp.mean(re * ce, axis=2) * (trimed > 0).astype(jnp.float32)[..., None]
    g = (jnp.dot(feat.reshape(B * L, E), params["w0"], precision="highest")
         + params["b0"]).reshape(B, L, C)
    residual = g.sum(axis=1)
    gT = jnp.transpose(g, (0, 2, 1)).reshape(B * C, L)
    h = jnp.maximum(jnp.dot(gT, params["w1"], precision="highest") + params["b1"], 0.0)
    res = jnp.dot(h, params["w2"], precision="highest").reshape(B, C) + params["b2"]
    return jax.nn.log_softmax(res + residual, axis=1)


if __name__ == "__main__":
    # small, forward-consistent shapes
    B = 2            # batch
    V = 50           # vocabulary_size
    E = 32           # embedding_size
    R = 7            # region_size
    S = 16           # max_sent_len
    C = 4            # num_classes
    rr = R // 2
    L = S - 2 * rr
    H1 = 2 * S

    key = jax.random.PRNGKey(0)
    k = jax.random.split(key, 10)

    # embedding: xavier_uniform over (V, R*E) (padding row not re-zeroed,
    # matching the PyTorch __init__ which applies xavier after padding_idx init)
    bound = (6.0 / (V + R * E)) ** 0.5
    emb = jax.random.uniform(k[0], (V, R * E), jnp.float32, -bound, bound)
    # embedding_region: default init with padding row 0 zeroed
    emb_region = jax.random.normal(k[1], (V, E), dtype=jnp.float32)
    emb_region = emb_region.at[0].set(0.0)

    def linear(kw, kb, fan_in, fan_out):
        b = 1.0 / (fan_in ** 0.5)
        W = jax.random.uniform(kw, (fan_in, fan_out), jnp.float32, -b, b)
        bias = jax.random.uniform(kb, (1, fan_out), jnp.float32, -b, b)
        return W, bias

    w0, b0 = linear(k[2], k[3], E, C)      # dense0: E -> C
    w1, b1 = linear(k[4], k[5], L, H1)     # dense1: L -> 2*S
    w2, b2 = linear(k[6], k[7], H1, 1)     # dense2: 2*S -> 1

    params = dict(emb=emb, emb_region=emb_region,
                  w0=w0, b0=b0, w1=w1, b1=b1, w2=w2, b2=b2)

    # token ids in [0, V); 0 acts as padding_idx
    x = jax.random.randint(k[8], (B, S), 0, V, dtype=jnp.int32)

    out = exam_forward(x, params, num_classes=C, embedding_size=E,
                       region_size=R, max_sent_len=S)
    out = jax.block_until_ready(out)

    ref = exam_reference(x, params, num_classes=C, embedding_size=E,
                         region_size=R, max_sent_len=S)
    assert out.shape == (B, C)
    assert jnp.allclose(out, ref, atol=2e-3, rtol=2e-3), (out, ref)

    print("KERNEL_OK")
</pallas_src>

<mosaic_0001>
module attributes {stable_mosaic.version = 11 : i64} {
  func.func @exam_kernel(%arg0: i32, %arg1: memref<2x16x32xbf16, #tpu.memory_space<vmem>>, %arg2: memref<2x10x7x32xbf16, #tpu.memory_space<vmem>>, %arg3: memref<2x10xf32, #tpu.memory_space<vmem>>, %arg4: memref<4x32xf32, #tpu.memory_space<vmem>>, %arg5: memref<4x1xf32, #tpu.memory_space<vmem>>, %arg6: memref<10x32xf32, #tpu.memory_space<vmem>>, %arg7: memref<1x32xf32, #tpu.memory_space<vmem>>, %arg8: memref<1x32xf32, #tpu.memory_space<vmem>>, %arg9: memref<1x1xf32, #tpu.memory_space<vmem>>, %arg10: memref<2x128xf32, #tpu.memory_space<vmem>>) attributes {dimension_semantics = [#tpu.dimension_semantics<parallel>], iteration_bounds = array<i64: 1>, scalar_prefetch = 0 : i64, scratch_operands = 0 : i64, tpu.core_type = #tpu.core_type<tc>, window_params = [{transform_indices = @transform_0, window_bounds = array<i64: 2, 16, 32>}, {transform_indices = @transform_1, window_bounds = array<i64: 2, 10, 7, 32>}, {transform_indices = @transform_2, window_bounds = array<i64: 2, 10>}, {pipeline_mode = #tpu.pipeline_mode<synchronous>, transform_indices = @transform_3, window_bounds = array<i64: 4, 32>}, {pipeline_mode = #tpu.pipeline_mode<synchronous>, transform_indices = @transform_4, window_bounds = array<i64: 4, 1>}, {pipeline_mode = #tpu.pipeline_mode<synchronous>, transform_indices = @transform_5, window_bounds = array<i64: 10, 32>}, {pipeline_mode = #tpu.pipeline_mode<synchronous>, transform_indices = @transform_6, window_bounds = array<i64: 1, 32>}, {pipeline_mode = #tpu.pipeline_mode<synchronous>, transform_indices = @transform_7, window_bounds = array<i64: 1, 32>}, {pipeline_mode = #tpu.pipeline_mode<synchronous>, transform_indices = @transform_8, window_bounds = array<i64: 1, 1>}, {transform_indices = @transform_9, window_bounds = array<i64: 2, 128>}]} {
    %c0 = arith.constant 0 : index
    %c0_0 = arith.constant 0 : index
    %c0_1 = arith.constant 0 : index
    %0 = vector.load %arg1[%c0, %c0_0, %c0_1] : memref<2x16x32xbf16, #tpu.memory_space<vmem>>, vector<2x16x32xbf16>
    %1 = arith.extf %0 : vector<2x16x32xbf16> to vector<2x16x32xf32>
    %c0_2 = arith.constant 0 : index
    %c0_3 = arith.constant 0 : index
    %c0_4 = arith.constant 0 : index
    %c0_5 = arith.constant 0 : index
    %2 = vector.load %arg2[%c0_2, %c0_3, %c0_4, %c0_5] : memref<2x10x7x32xbf16, #tpu.memory_space<vmem>>, vector<2x10x7x32xbf16>
    %c0_6 = arith.constant 0 : index
    %c0_7 = arith.constant 0 : index
    %3 = vector.load %arg3[%c0_6, %c0_7] : memref<2x10xf32, #tpu.memory_space<vmem>>, vector<2x10xf32>
    %cst = arith.constant 0.000000e+00 : f32
    %4 = vector.broadcast %cst : f32 to vector<2x10x32xf32>
    %5 = vector.extract_strided_slice %1 {offsets = [0, 0, 0], sizes = [2, 10, 32], strides = [1, 1, 1]} : vector<2x16x32xf32> to vector<2x10x32xf32>
    %6 = vector.extract_strided_slice %2 {offsets = [0, 0, 0, 0], sizes = [2, 10, 1, 32], strides = [1, 1, 1, 1]} : vector<2x10x7x32xbf16> to vector<2x10x1x32xbf16>
    %7 = vector.shape_cast %6 : vector<2x10x1x32xbf16> to vector<2x10x32xbf16>
    %8 = arith.extf %7 : vector<2x10x32xbf16> to vector<2x10x32xf32>
    %9 = arith.mulf %5, %8 : vector<2x10x32xf32>
    %10 = arith.addf %4, %9 : vector<2x10x32xf32>
    %11 = vector.extract_strided_slice %1 {offsets = [0, 1, 0], sizes = [2, 10, 32], strides = [1, 1, 1]} : vector<2x16x32xf32> to vector<2x10x32xf32>
    %12 = vector.extract_strided_slice %2 {offsets = [0, 0, 1, 0], sizes = [2, 10, 1, 32], strides = [1, 1, 1, 1]} : vector<2x10x7x32xbf16> to vector<2x10x1x32xbf16>
    %13 = vector.shape_cast %12 : vector<2x10x1x32xbf16> to vector<2x10x32xbf16>
    %14 = arith.extf %13 : vector<2x10x32xbf16> to vector<2x10x32xf32>
    %15 = arith.mulf %11, %14 : vector<2x10x32xf32>
    %16 = arith.addf %10, %15 : vector<2x10x32xf32>
    %17 = vector.extract_strided_slice %1 {offsets = [0, 2, 0], sizes = [2, 10, 32], strides = [1, 1, 1]} : vector<2x16x32xf32> to vector<2x10x32xf32>
    %18 = vector.extract_strided_slice %2 {offsets = [0, 0, 2, 0], sizes = [2, 10, 1, 32], strides = [1, 1, 1, 1]} : vector<2x10x7x32xbf16> to vector<2x10x1x32xbf16>
    %19 = vector.shape_cast %18 : vector<2x10x1x32xbf16> to vector<2x10x32xbf16>
    %20 = arith.extf %19 : vector<2x10x32xbf16> to vector<2x10x32xf32>
    %21 = arith.mulf %17, %20 : vector<2x10x32xf32>
    %22 = arith.addf %16, %21 : vector<2x10x32xf32>
    %23 = vector.extract_strided_slice %1 {offsets = [0, 3, 0], sizes = [2, 10, 32], strides = [1, 1, 1]} : vector<2x16x32xf32> to vector<2x10x32xf32>
    %24 = vector.extract_strided_slice %2 {offsets = [0, 0, 3, 0], sizes = [2, 10, 1, 32], strides = [1, 1, 1, 1]} : vector<2x10x7x32xbf16> to vector<2x10x1x32xbf16>
    %25 = vector.shape_cast %24 : vector<2x10x1x32xbf16> to vector<2x10x32xbf16>
    %26 = arith.extf %25 : vector<2x10x32xbf16> to vector<2x10x32xf32>
    %27 = arith.mulf %23, %26 : vector<2x10x32xf32>
    %28 = arith.addf %22, %27 : vector<2x10x32xf32>
    %29 = vector.extract_strided_slice %1 {offsets = [0, 4, 0], sizes = [2, 10, 32], strides = [1, 1, 1]} : vector<2x16x32xf32> to vector<2x10x32xf32>
    %30 = vector.extract_strided_slice %2 {offsets = [0, 0, 4, 0], sizes = [2, 10, 1, 32], strides = [1, 1, 1, 1]} : vector<2x10x7x32xbf16> to vector<2x10x1x32xbf16>
    %31 = vector.shape_cast %30 : vector<2x10x1x32xbf16> to vector<2x10x32xbf16>
    %32 = arith.extf %31 : vector<2x10x32xbf16> to vector<2x10x32xf32>
    %33 = arith.mulf %29, %32 : vector<2x10x32xf32>
    %34 = arith.addf %28, %33 : vector<2x10x32xf32>
    %35 = vector.extract_strided_slice %1 {offsets = [0, 5, 0], sizes = [2, 10, 32], strides = [1, 1, 1]} : vector<2x16x32xf32> to vector<2x10x32xf32>
    %36 = vector.extract_strided_slice %2 {offsets = [0, 0, 5, 0], sizes = [2, 10, 1, 32], strides = [1, 1, 1, 1]} : vector<2x10x7x32xbf16> to vector<2x10x1x32xbf16>
    %37 = vector.shape_cast %36 : vector<2x10x1x32xbf16> to vector<2x10x32xbf16>
    %38 = arith.extf %37 : vector<2x10x32xbf16> to vector<2x10x32xf32>
    %39 = arith.mulf %35, %38 : vector<2x10x32xf32>
    %40 = arith.addf %34, %39 : vector<2x10x32xf32>
    %41 = vector.extract_strided_slice %1 {offsets = [0, 6, 0], sizes = [2, 10, 32], strides = [1, 1, 1]} : vector<2x16x32xf32> to vector<2x10x32xf32>
    %42 = vector.extract_strided_slice %2 {offsets = [0, 0, 6, 0], sizes = [2, 10, 1, 32], strides = [1, 1, 1, 1]} : vector<2x10x7x32xbf16> to vector<2x10x1x32xbf16>
    %43 = vector.shape_cast %42 : vector<2x10x1x32xbf16> to vector<2x10x32xbf16>
    %44 = arith.extf %43 : vector<2x10x32xbf16> to vector<2x10x32xf32>
    %45 = arith.mulf %41, %44 : vector<2x10x32xf32>
    %46 = arith.addf %40, %45 : vector<2x10x32xf32>
    %47 = vector.shape_cast %3 : vector<2x10xf32> to vector<2x10x1xf32>
    %cst_8 = arith.constant 0.142857149 : f32
    %48 = vector.broadcast %cst_8 : f32 to vector<2x10x1xf32>
    %49 = arith.mulf %47, %48 : vector<2x10x1xf32>
    %50 = vector.broadcast %49 : vector<2x10x1xf32> to vector<2x10x32xf32>
    %51 = arith.mulf %46, %50 : vector<2x10x32xf32>
    %c0_9 = arith.constant 0 : index
    %c0_10 = arith.constant 0 : index
    %52 = vector.load %arg4[%c0_9, %c0_10] : memref<4x32xf32, #tpu.memory_space<vmem>>, vector<4x32xf32>
    %53 = vector.extract_strided_slice %52 {offsets = [0, 0], sizes = [1, 32], strides = [1, 1]} : vector<4x32xf32> to vector<1x32xf32>
    %54 = vector.shape_cast %53 : vector<1x32xf32> to vector<32xf32>
    %55 = vector.shape_cast %54 : vector<32xf32> to vector<1x1x32xf32>
    %56 = vector.broadcast %55 : vector<1x1x32xf32> to vector<2x10x32xf32>
    %57 = arith.mulf %51, %56 : vector<2x10x32xf32>
    %cst_11 = arith.constant dense<0.000000e+00> : vector<2x10xf32>
    %58 = vector.multi_reduction <add>, %57, %cst_11 [2] : vector<2x10x32xf32> to vector<2x10xf32>
    %59 = vector.extract_strided_slice %52 {offsets = [1, 0], sizes = [1, 32], strides = [1, 1]} : vector<4x32xf32> to vector<1x32xf32>
    %60 = vector.shape_cast %59 : vector<1x32xf32> to vector<32xf32>
    %61 = vector.shape_cast %60 : vector<32xf32> to vector<1x1x32xf32>
    %62 = vector.broadcast %61 : vector<1x1x32xf32> to vector<2x10x32xf32>
    %63 = arith.mulf %51, %62 : vector<2x10x32xf32>
    %cst_12 = arith.constant dense<0.000000e+00> : vector<2x10xf32>
    %64 = vector.multi_reduction <add>, %63, %cst_12 [2] : vector<2x10x32xf32> to vector<2x10xf32>
    %65 = vector.extract_strided_slice %52 {offsets = [2, 0], sizes = [1, 32], strides = [1, 1]} : vector<4x32xf32> to vector<1x32xf32>
    %66 = vector.shape_cast %65 : vector<1x32xf32> to vector<32xf32>
    %67 = vector.shape_cast %66 : vector<32xf32> to vector<1x1x32xf32>
    %68 = vector.broadcast %67 : vector<1x1x32xf32> to vector<2x10x32xf32>
    %69 = arith.mulf %51, %68 : vector<2x10x32xf32>
    %cst_13 = arith.constant dense<0.000000e+00> : vector<2x10xf32>
    %70 = vector.multi_reduction <add>, %69, %cst_13 [2] : vector<2x10x32xf32> to vector<2x10xf32>
    %71 = vector.extract_strided_slice %52 {offsets = [3, 0], sizes = [1, 32], strides = [1, 1]} : vector<4x32xf32> to vector<1x32xf32>
    %72 = vector.shape_cast %71 : vector<1x32xf32> to vector<32xf32>
    %73 = vector.shape_cast %72 : vector<32xf32> to vector<1x1x32xf32>
    %74 = vector.broadcast %73 : vector<1x1x32xf32> to vector<2x10x32xf32>
    %75 = arith.mulf %51, %74 : vector<2x10x32xf32>
    %cst_14 = arith.constant dense<0.000000e+00> : vector<2x10xf32>
    %76 = vector.multi_reduction <add>, %75, %cst_14 [2] : vector<2x10x32xf32> to vector<2x10xf32>
    %77 = vector.shape_cast %58 : vector<2x10xf32> to vector<1x2x10xf32>
    %78 = vector.shape_cast %64 : vector<2x10xf32> to vector<1x2x10xf32>
    %79 = vector.shape_cast %70 : vector<2x10xf32> to vector<1x2x10xf32>
    %80 = vector.shape_cast %76 : vector<2x10xf32> to vector<1x2x10xf32>
    %81 = tpu.concatenate %77, %78, %79, %80 in 0 : vector<1x2x10xf32>, vector<1x2x10xf32>, vector<1x2x10xf32>, vector<1x2x10xf32> -> vector<4x2x10xf32>
    %c0_15 = arith.constant 0 : index
    %c0_16 = arith.constant 0 : index
    %82 = vector.load %arg5[%c0_15, %c0_16] : memref<4x1xf32, #tpu.memory_space<vmem>>, vector<4x1xf32>
    %83 = vector.shape_cast %82 : vector<4x1xf32> to vector<4x1x1xf32>
    %84 = vector.broadcast %83 : vector<4x1x1xf32> to vector<4x2x10xf32>
    %85 = arith.addf %81, %84 : vector<4x2x10xf32>
    %cst_17 = arith.constant dense<0.000000e+00> : vector<4x2xf32>
    %86 = vector.multi_reduction <add>, %85, %cst_17 [2] : vector<4x2x10xf32> to vector<4x2xf32>
    %87 = vector.shape_cast %85 : vector<4x2x10xf32> to vector<8x10xf32>
    %c0_18 = arith.constant 0 : index
    %c0_19 = arith.constant 0 : index
    %88 = vector.load %arg6[%c0_18, %c0_19] : memref<10x32xf32, #tpu.memory_space<vmem>>, vector<10x32xf32>
    %cst_20 = arith.constant dense<0.000000e+00> : vector<8x32xf32>
    %89 = tpu.matmul %87, %88, %cst_20 {dimension_numbers = #tpu.dot_dimension_numbers<[1], [0], [0], [1], [0, 0, 1, 1], [], []>} : vector<8x10xf32>, vector<10x32xf32>, vector<8x32xf32> -> vector<8x32xf32>
    %c0_21 = arith.constant 0 : index
    %c0_22 = arith.constant 0 : index
    %90 = vector.load %arg7[%c0_21, %c0_22] : memref<1x32xf32, #tpu.memory_space<vmem>>, vector<1x32xf32>
    %91 = vector.broadcast %90 : vector<1x32xf32> to vector<8x32xf32>
    %92 = arith.addf %89, %91 : vector<8x32xf32>
    %cst_23 = arith.constant 0.000000e+00 : f32
    %93 = vector.broadcast %cst_23 : f32 to vector<8x32xf32>
    %94 = arith.maximumf %92, %93 : vector<8x32xf32>
    %c0_24 = arith.constant 0 : index
    %c0_25 = arith.constant 0 : index
    %95 = vector.load %arg8[%c0_24, %c0_25] : memref<1x32xf32, #tpu.memory_space<vmem>>, vector<1x32xf32>
    %96 = vector.broadcast %95 : vector<1x32xf32> to vector<8x32xf32>
    %97 = arith.mulf %94, %96 : vector<8x32xf32>
    %cst_26 = arith.constant dense<0.000000e+00> : vector<8xf32>
    %98 = vector.multi_reduction <add>, %97, %cst_26 [1] : vector<8x32xf32> to vector<8xf32>
    %99 = vector.shape_cast %98 : vector<8xf32> to vector<8x1xf32>
    %100 = vector.shape_cast %99 : vector<8x1xf32> to vector<4x2xf32>
    %c0_27 = arith.constant 0 : index
    %c0_28 = arith.constant 0 : index
    %101 = vector.load %arg9[%c0_27, %c0_28] : memref<1x1xf32, #tpu.memory_space<vmem>>, vector<1x1xf32>
    %102 = vector.broadcast %101 : vector<1x1xf32> to vector<4x2xf32>
    %103 = arith.addf %100, %102 : vector<4x2xf32>
    %104 = arith.addf %103, %86 : vector<4x2xf32>
    %105 = tpu.transpose %104, [1, 0] : vector<4x2xf32> -> vector<2x4xf32>
    %cst_29 = arith.constant dense<0xFF800000> : vector<2xf32>
    %106 = vector.multi_reduction <maximumf>, %105, %cst_29 [1] : vector<2x4xf32> to vector<2xf32>
    %107 = vector.shape_cast %106 : vector<2xf32> to vector<2x1xf32>
    %108 = vector.broadcast %107 : vector<2x1xf32> to vector<2x4xf32>
    %109 = arith.subf %105, %108 : vector<2x4xf32>
    %110 = math.exp %109 : vector<2x4xf32>
    %cst_30 = arith.constant dense<0.000000e+00> : vector<2xf32>
    %111 = vector.multi_reduction <add>, %110, %cst_30 [1] : vector<2x4xf32> to vector<2xf32>
    %112 = vector.shape_cast %111 : vector<2xf32> to vector<2x1xf32>
    %113 = math.log %112 : vector<2x1xf32>
    %114 = vector.broadcast %113 : vector<2x1xf32> to vector<2x4xf32>
    %115 = arith.subf %109, %114 : vector<2x4xf32>
    %cst_31 = arith.constant 0.000000e+00 : f32
    %116 = vector.broadcast %cst_31 : f32 to vector<2x124xf32>
    %117 = tpu.concatenate %115, %116 in 1 : vector<2x4xf32>, vector<2x124xf32> -> vector<2x128xf32>
    %c0_32 = arith.constant 0 : index
    %c0_33 = arith.constant 0 : index
    %118 = vector.load %arg10[%c0_32, %c0_33] : memref<2x128xf32, #tpu.memory_space<vmem>>, vector<2x128xf32>
    tpu.vector_store %arg10[%c0_32, %c0_33], %117 {strides = array<i32>} : memref<2x128xf32, #tpu.memory_space<vmem>>, vector<2x128xf32>,
    return
  }
  func.func @transform_0(%arg0: i32) -> (i32, i32, i32) {
    %c0_i32 = arith.constant 0 : i32
    %c0_i32_0 = arith.constant 0 : i32
    %c0_i32_1 = arith.constant 0 : i32
    return %arg0, %c0_i32, %c0_i32_0 : i32, i32, i32
  }
  func.func @transform_1(%arg0: i32) -> (i32, i32, i32, i32) {
    %c0_i32 = arith.constant 0 : i32
    %c0_i32_0 = arith.constant 0 : i32
    %c0_i32_1 = arith.constant 0 : i32
    %c0_i32_2 = arith.constant 0 : i32
    return %arg0, %c0_i32, %c0_i32_0, %c0_i32_1 : i32, i32, i32, i32
  }
  func.func @transform_2(%arg0: i32) -> (i32, i32) {
    %c0_i32 = arith.constant 0 : i32
    %c0_i32_0 = arith.constant 0 : i32
    return %arg0, %c0_i32 : i32, i32
  }
  func.func @transform_3(%arg0: i32) -> (i32, i32) {
    %c0_i32 = arith.constant 0 : i32
    %c0_i32_0 = arith.constant 0 : i32
    %c0_i32_1 = arith.constant 0 : i32
    return %c0_i32, %c0_i32_0 : i32, i32
  }
  func.func @transform_4(%arg0: i32) -> (i32, i32) {
    %c0_i32 = arith.constant 0 : i32
    %c0_i32_0 = arith.constant 0 : i32
    %c0_i32_1 = arith.constant 0 : i32
    return %c0_i32, %c0_i32_0 : i32, i32
  }
  func.func @transform_5(%arg0: i32) -> (i32, i32) {
    %c0_i32 = arith.constant 0 : i32
    %c0_i32_0 = arith.constant 0 : i32
    %c0_i32_1 = arith.constant 0 : i32
    return %c0_i32, %c0_i32_0 : i32, i32
  }
  func.func @transform_6(%arg0: i32) -> (i32, i32) {
    %c0_i32 = arith.constant 0 : i32
    %c0_i32_0 = arith.constant 0 : i32
    %c0_i32_1 = arith.constant 0 : i32
    return %c0_i32, %c0_i32_0 : i32, i32
  }
  func.func @transform_7(%arg0: i32) -> (i32, i32) {
    %c0_i32 = arith.constant 0 : i32
    %c0_i32_0 = arith.constant 0 : i32
    %c0_i32_1 = arith.constant 0 : i32
    return %c0_i32, %c0_i32_0 : i32, i32
  }
  func.func @transform_8(%arg0: i32) -> (i32, i32) {
    %c0_i32 = arith.constant 0 : i32
    %c0_i32_0 = arith.constant 0 : i32
    %c0_i32_1 = arith.constant 0 : i32
    return %c0_i32, %c0_i32_0 : i32, i32
  }
  func.func @transform_9(%arg0: i32) -> (i32, i32) {
    %c0_i32 = arith.constant 0 : i32
    %c0_i32_0 = arith.constant 0 : i32
    return %arg0, %c0_i32 : i32, i32
  }
}

</mosaic_0001>

<bundles_post_ra>
// kernel: tpu_custom_call.1
= control target key start
LH: loop header
LB: loop body
LE: loop exit
PB: predicated region body
PF: predicated region fallthrough
CT: control target
= control target key end

     0   :  { %s1562_s0 = inlined_call_operand.vmem [shape: bf16[2,16,32], index: 0, kind: input, shape index: {}]   ;;  %s1563_s1 = inlined_call_operand.vmem [shape: bf16[2,10,7,32], index: 1, kind: input, shape index: {}]   ;;  %s1564_s2 = inlined_call_operand.vmem [shape: f32[2,10], index: 2, kind: input, shape index: {}]   ;;  %s1565_s3 = inlined_call_operand.vmem [shape: f32[4,32], index: 3, kind: input, shape index: {}]   ;;  %s1566_s4 = inlined_call_operand.vmem [shape: f32[4,1], index: 4, kind: input, shape index: {}]   ;;  %s1567_s5 = inlined_call_operand.vmem [shape: f32[10,32], index: 5, kind: input, shape index: {}]   ;;  %s1568_s6 = inlined_call_operand.vmem [shape: f32[1,32], index: 6, kind: input, shape index: {}]   ;;  %s1569_s7 = inlined_call_operand.vmem [shape: f32[1,32], index: 7, kind: input, shape index: {}]   ;;  %s1570_s8 = inlined_call_operand.<no memory space> [shape: f32[1,1], index: 8, kind: input, shape index: {}]   ;;  %s1571_s9 = inlined_call_operand.hbm [shape: f32[2,128], index: 9, kind: output, shape index: {}]  }
   0x1   :  { %v14_v0 = vstv %s1570_s8 }
   0x2   :  { %15 = vst [vmem:[#allocation2] sm:$0x1] %v14_v0 }
   0x3   :  { %v414_v1 = vlaneseq  ;;  %v1021_v2 = vld [vmem:[%s1566_s4] sm:$0xf]  ;;  %v959_v3 = vmov 0  }
   0x4   :  { %922 = vset.pattern.permute.xlu2 %v959_v3  ;;  %v523_v4 = vperm.slane %v1021_v2, 0  ;;  %v521_v6 = vrot.slane %v1021_v2, 2 }
   0x5   :  { %v415_v5 = vshrl.u32 %v414_v1, 7 }
   0x6   :  { %528 = vperm.xlu2 %922, %v523_v4  }
   0x7   :  { %16 = vsyncpa [#allocation4], 0  ;;  %921 = vset.pattern.permute.xlu1 %v415_v5  ;;  %919 = vset.pattern.permute.xlu0 %v415_v5  ;;  %v63_v7 = vld [vmem:[%s1564_s2] sm:$0x3]  ;;  %v525_v8 = vperm.slane %v521_v6, 0  ;;  %v422_v11 = vadd.s32 8, %v415_v5 }
   0x8   :  { %v426_v9 = vperm.slane %v63_v7, 1  ;;  %v413_v10 = vperm.slane %v63_v7, 0  ;;  %v520_v12 = vrot.slane %v1021_v2, 1  ;;  %v907_v14 = vld [vmem:[%s1563_s1 + $0x28] sm:$0xff]   ;;  %vm105_vm0 = vcmask 1041409   ;;  %v908_v16 = vld [vmem:[%s1563_s1 + $0x30] sm:$0xff]  }
   0x9   :  { %v885_v15 = vunpack.c.h.bf16 %v907_v14  ;;  %vm108_vm1 = vcmask 1042434   ;;  %vm111_vm2 = vcmask 1043459   ;;  %vm114_vm3 = vcmask 1044484   ;;  %v909_v20 = vld [vmem:[%s1563_s1 + $0x38] sm:$0xff]   ;;  %v910_v23 = vld [vmem:[%s1563_s1 + $0x40] sm:$0xff]   ;;  %v911_v27 = vld [vmem:[%s1563_s1 + $0x48] sm:$0xff]  }
   0xa   :  { %v524_v13 = vperm.slane %v520_v12, 0  ;;  %v888_v17 = vunpack.c.l.bf16 %v908_v16  ;;  %vm117_vm4 = vcmask 1045509   ;;  %v1036_v18 = vunpack.c.l.bf16 %v907_v14  ;;  %v902_v38 = vld [vmem:[%s1562_s0 + $0x8] sm:$0xff]   ;;  %s843_s20 = sshll.u32 %s1571_s9, 4  ;;  %s844_s20 = int_to_ptr.hbm [resolvable:$true] %s843_s20 }
   0xb   :  { %v889_v19 = vunpack.c.h.bf16 %v908_v16  ;;  %v1041_v21 = vrot.slane %v885_v15, 7  ;;  %vm120_vm5 = vcmask 1046534   ;;  %vm123_vm6 = vcmask 1047559  }
   0xc   :  { %v892_v22 = vunpack.c.l.bf16 %v909_v20  ;;  %v1046_v24 = vrot.slane %v888_v17, 6  ;;  %vm183_vm7 = vcmask 1046528   ;;  %v893_v25 = vunpack.c.h.bf16 %v909_v20 }
   0xd   :  { %v897_v26 = vunpack.c.h.bf16 %v910_v23  ;;  %v1051_v28 = vrot.slane %v889_v19, 5  ;;  %v163_v29 = vsel %vm108_vm1, %v1041_v21, %v1036_v18  ;;  %v896_v30 = vunpack.c.l.bf16 %v910_v23 }
   0xe   :  { %536 = vperm.xlu2 %922, %v525_v8   ;;  %v901_v31 = vunpack.c.h.bf16 %v911_v27  ;;  %v1056_v32 = vrot.slane %v892_v22, 4  ;;  %v164_v33 = vsel %vm111_vm2, %v1046_v24, %v163_v29  ;;  %v1060_v34 = vunpack.c.l.bf16 %v911_v27  ;;  %v863_v29 = vld [vmem:[%s1563_s1] sm:$0xff]  }
   0xf   :  { %431 = vperm.xlu1 %921, %v426_v9   ;;  %418 = vperm.xlu0 %919, %v413_v10   ;;  %v128_v35 = vsel %vm105_vm0, %v1041_v21, %v1036_v18  ;;  %v1065_v36 = vrot.slane %v893_v25, 3  ;;  %v1067_v37 = vrot.slane %v897_v26, 1  ;;  %v1074_v40 = vrot.slane %v896_v30, 2 }
  0x10   :  { %v130_v39 = vsel %vm108_vm1, %v1046_v24, %v128_v35  ;;  %v1076_v41 = vrot.slane %v901_v31, 7  ;;  %v165_v42 = vsel %vm114_vm3, %v1051_v28, %v164_v33  ;;  %v1080_v43 = vunpack.c.l.bf16 %v902_v38 }
  0x11   :  { %v1082_v44 = vunpack.c.h.bf16 %v902_v38  ;;  %v132_v45 = vsel %vm111_vm2, %v1051_v28, %v130_v39  ;;  %v166_v46 = vsel %vm117_vm4, %v1056_v32, %v165_v42  ;;  %vm226_vm8 = vcmask 1045504  }
  0x12   :  { %v134_v47 = vsel %vm114_vm3, %v1056_v32, %v132_v45  ;;  %v167_v48 = vsel %vm120_vm5, %v1065_v36, %v166_v46  ;;  %v169_v49 = vsel %vm105_vm0, %v1060_v34, %v1067_v37  ;;  %v206_v50 = vsel %vm111_vm2, %v1041_v21, %v1036_v18 }
  0x13   :  { %v136_v51 = vsel %vm117_vm4, %v1065_v36, %v134_v47  ;;  %v168_v52 = vsel %vm123_vm6, %v1074_v40, %v167_v48  ;;  %v170_v53 = vsel %vm108_vm1, %v1076_v41, %v169_v49  ;;  %v207_v54 = vsel %vm114_vm3, %v1046_v24, %v206_v50  ;;  %v903_v50 = vld [vmem:[%s1563_s1 + $0x8] sm:$0xff]  }
  0x14   :  { %v138_v55 = vsel %vm120_vm5, %v1074_v40, %v136_v51  ;;  %v177_v56 = vmul.f32 %v1080_v43, %v168_v52  ;;  %v1110_v57 = vmul.f32 %v1082_v44, %v170_v53  ;;  %v208_v58 = vsel %vm117_vm4, %v1051_v28, %v207_v54 }
  0x15   :  { %vm269_vm9 = vcmask 1044480   ;;  %v140_v59 = vsel %vm123_vm6, %v1067_v37, %v138_v55  ;;  %v209_v60 = vsel %vm120_vm5, %v1056_v32, %v208_v58  ;;  %v211_v61 = vsel %vm105_vm0, %v1067_v37, %v1074_v40 }
  0x16   :  { %v249_v62 = vsel %vm114_vm3, %v1041_v21, %v1036_v18  ;;  %v149_v63 = vmul.f32 %v1080_v43, %v140_v59  ;;  %v187_v0 = vrot.slane %v177_v56, 1  ;;  %v210_v4 = vsel %vm123_vm6, %v1065_v36, %v209_v60  ;;  %v904_v60 = vld [vmem:[%s1563_s1 + $0x10] sm:$0xff]  }
  0x17   :  { %920 = vset.pattern.permute.xlu0 %v422_v11  ;;  %924 = vset.pattern.permute.xlu1 %v422_v11  ;;  %v212_v5 = vsel %vm108_vm1, %v1060_v34, %v211_v61  ;;  %v220_v6 = vmul.f32 %v1080_v43, %v210_v4  ;;  %v250_v7 = vsel %vm117_vm4, %v1046_v24, %v249_v62  ;;  %vm312_vm10 = vcmask 1043456  }
  0x18   :  { %v253_v8 = vsel %vm105_vm0, %v1074_v40, %v1065_v36  ;;  %v251_v11 = vsel %vm120_vm5, %v1051_v28, %v250_v7  ;;  %v292_v20 = vsel %vm117_vm4, %v1041_v21, %v1036_v18  ;;  %v295_v22 = vsel %vm105_vm0, %v1065_v36, %v1056_v32 }
  0x19   :  { %v254_v12 = vsel %vm108_vm1, %v1067_v37, %v253_v8  ;;  %v230_v15 = vrot.slane %v220_v6, 2  ;;  %v252_v16 = vsel %vm123_vm6, %v1056_v32, %v251_v11  ;;  %v293_v26 = vsel %vm120_vm5, %v1046_v24, %v292_v20 }
  0x1a   :  { %v255_v17 = vsel %vm111_vm2, %v1060_v34, %v254_v12  ;;  %v263_v19 = vmul.f32 %v1080_v43, %v252_v16  ;;  %v296_v27 = vsel %vm108_vm1, %v1074_v40, %v295_v22  ;;  %v294_v33 = vsel %vm123_vm6, %v1051_v28, %v293_v26 }
  0x1b   :  { %v256_v25 = vsel %vm114_vm3, %v1076_v41, %v255_v17  ;;  %v297_v35 = vsel %vm111_vm2, %v1067_v37, %v296_v27  ;;  %v306_v42 = vmul.f32 %v1080_v43, %v294_v33  ;;  %v335_v45 = vsel %vm120_vm5, %v1041_v21, %v1036_v18 }
  0x1c   :  { %v1170_v30 = vmul.f32 %v1082_v44, %v256_v25  ;;  %v273_v31 = vrot.slane %v263_v19, 3  ;;  %v298_v39 = vsel %vm114_vm3, %v1060_v34, %v297_v35  ;;  %v336_v48 = vsel %vm123_vm6, %v1046_v24, %v335_v45 }
  0x1d   :  { %v299_v47 = vsel %vm117_vm4, %v1076_v41, %v298_v39  ;;  %v865_v49 = vunpack.c.h.bf16 %v863_v29  ;;  %v316_v53 = vrot.slane %v306_v42, 4  ;;  %v337_v54 = vsel %vm105_vm0, %v1056_v32, %v1051_v28 }
  0x1e   :  { %v274_v46 = vrot.slane %v1170_v30, 3  ;;  %v1194_v52 = vmul.f32 %v1082_v44, %v299_v47  ;;  %v338_v56 = vsel %vm108_vm1, %v1065_v36, %v337_v54  ;;  %v1205_v58 = vmul.f32 %v1080_v43, %v336_v48 }
  0x1f   :  { %424 = vperm.xlu0 %920, %v413_v10   ;;  %437 = vperm.xlu1 %924, %v426_v9   ;;  %v213_v10 = vsel %vm111_vm2, %v1076_v41, %v212_v5  ;;  %v379_v59 = vsel %vm105_vm0, %v1051_v28, %v1046_v24  ;;  %v339_v62 = vsel %vm111_vm2, %v1074_v40, %v338_v56  ;;  %v855_v28 = vld [vmem:[%s1562_s0] sm:$0xff]   ;;  %v1226_v5 = vunpack.c.l.bf16 %v863_v29 }
  0x20   :  { %v1146_v14 = vmul.f32 %v1082_v44, %v213_v10  ;;  %v275_v55 = vsel %vm269_vm9, %v273_v31, %v274_v46  ;;  %v317_v61 = vrot.slane %v1194_v52, 4  ;;  %v340_v4 = vsel %vm114_vm3, %v1067_v37, %v339_v62 }
  0x21   :  { %v380_v24 = vsel %vm108_vm1, %v1056_v32, %v379_v59  ;;  %v869_v6 = vunpack.c.h.bf16 %v903_v50  ;;  %v341_v8 = vsel %vm117_vm4, %v1060_v34, %v340_v4  ;;  %v906_v32 = vld [vmem:[%s1563_s1 + $0x20] sm:$0xff]   ;;  %v359_v11 = vrot.slane %v1205_v58, 5 }
  0x22   :  { %v231_v23 = vrot.slane %v1146_v14, 2  ;;  %v318_v10 = vsel %vm312_vm10, %v316_v53, %v317_v61  ;;  %v1251_v16 = vunpack.c.l.bf16 %v855_v28  ;;  %v873_v17 = vunpack.c.h.bf16 %v904_v60 }
  0x23   :  { %v881_v25 = vunpack.c.h.bf16 %v906_v32  ;;  %v1261_v27 = vrot.slane %v865_v49, 7  ;;  %vm355_vm11 = vcmask 1042432   ;;  %vm398_vm12 = vcmask 1041408  }
  0x24   :  { %v232_v38 = vsel %vm226_vm8, %v230_v15, %v231_v23  ;;  %v1282_v47 = vrot.slane %v873_v17, 3  ;;  %vm453_vm13 = vcmask 261120   ;;  %vm457_vm14 = vcmask 254976  }
  0x25   :  { %v106_v35 = vsel %vm105_vm0, %v1261_v27, %v1226_v5  ;;  %v1286_v49 = vrot.slane %v881_v25, 7  ;;  %v198_v54 = vsel %vm111_vm2, %v1261_v27, %v1226_v5  ;;  %vm628_vm15 = vcmask 130112  }
  0x27   :  { %923 = vset.pattern.permute.xlu0 %v959_v3  ;;  %925 = vset.pattern.permute.xlu1 %v959_v3  ;;  %v188_v3 = vrot.slane %v1110_v57, 1 }
  0x28   :  { %532 = vperm.xlu0 %923, %v524_v13  }
  0x29   :  { %v189_v9 = vsel %vm183_vm7, %v187_v0, %v188_v3  ;;  %v868_v0 = vunpack.c.l.bf16 %v903_v50 }
  0x2a   :  { %v196_v13 = vadd.f32 %v189_v9, %v149_v63  ;;  %v378_v63 = vsel %vm123_vm6, %v1041_v21, %v1036_v18  ;;  %v381_v18 = vsel %vm111_vm2, %v1065_v36, %v380_v24  ;;  %v872_v21 = vunpack.c.l.bf16 %v904_v60  ;;  %v905_v9 = vld [vmem:[%s1563_s1 + $0x18] sm:$0xff]  }
  0x2b   :  { %v382_v12 = vsel %vm114_vm3, %v1074_v40, %v381_v18  ;;  %v1245_v36 = vmul.f32 %v1080_v43, %v378_v63  ;;  %v876_v20 = vunpack.c.l.bf16 %v905_v9  ;;  %v877_v22 = vunpack.c.h.bf16 %v905_v9 }
  0x2c   :  { %v239_v51 = vadd.f32 %v232_v38, %v196_v13  ;;  %v342_v13 = vsel %vm120_vm5, %v1076_v41, %v341_v8  ;;  %v383_v15 = vsel %vm117_vm4, %v1067_v37, %v382_v12  ;;  %v1257_v40 = vunpack.c.h.bf16 %v855_v28 }
  0x2d   :  { %v384_v19 = vsel %vm120_vm5, %v1060_v34, %v383_v15  ;;  %v1259_v43 = vunpack.c.l.bf16 %v906_v32  ;;  %v1264_v29 = vmul.f32 %v1082_v44, %v342_v13  ;;  %v402_v31 = vrot.slane %v1245_v36, 6 }
  0x2e   :  { %v282_v7 = vadd.f32 %v275_v55, %v239_v51  ;;  %v385_v37 = vsel %vm123_vm6, %v1076_v41, %v384_v19  ;;  %v1269_v33 = vrot.slane %v868_v0, 6  ;;  %v1274_v38 = vrot.slane %v869_v6, 5 }
  0x2f   :  { %v1276_v39 = vrot.slane %v872_v21, 4  ;;  %v1278_v42 = vrot.slane %v877_v22, 1  ;;  %v1284_v48 = vrot.slane %v876_v20, 2  ;;  %v155_v51 = vsel %vm108_vm1, %v1261_v27, %v1226_v5 }
  0x30   :  { %v1255_v26 = vadd.f32 %v318_v10, %v282_v7  ;;  %v109_v45 = vsel %vm108_vm1, %v1269_v33, %v106_v35  ;;  %v360_v55 = vrot.slane %v1264_v29, 5  ;;  %v156_v59 = vsel %vm111_vm2, %v1269_v33, %v155_v51 }
  0x31   :  { %v112_v50 = vsel %vm111_vm2, %v1274_v38, %v109_v45  ;;  %v161_v53 = vsel %vm105_vm0, %v1259_v43, %v1278_v42  ;;  %v1307_v62 = vmul.f32 %v1082_v44, %v385_v37  ;;  %v157_v0 = vsel %vm114_vm3, %v1274_v38, %v156_v59 }
  0x32   :  { %v115_v56 = vsel %vm114_vm3, %v1276_v39, %v112_v50  ;;  %v162_v60 = vsel %vm108_vm1, %v1286_v49, %v161_v53  ;;  %v158_v28 = vsel %vm117_vm4, %v1276_v39, %v157_v0  ;;  %v199_v6 = vsel %vm114_vm3, %v1269_v33, %v198_v54 }
  0x33   :  { %v118_v63 = vsel %vm117_vm4, %v1282_v47, %v115_v56  ;;  %v1314_v4 = vmul.f32 %v1257_v40, %v162_v60  ;;  %v203_v7 = vsel %vm105_vm0, %v1278_v42, %v1284_v48  ;;  %v159_v18 = vsel %vm120_vm5, %v1282_v47, %v158_v28 }
  0x34   :  { %v121_v24 = vsel %vm120_vm5, %v1284_v48, %v118_v63  ;;  %v200_v9 = vsel %vm117_vm4, %v1274_v38, %v199_v6  ;;  %v160_v10 = vsel %vm123_vm6, %v1284_v48, %v159_v18  ;;  %v204_v13 = vsel %vm108_vm1, %v1259_v43, %v203_v7 }
  0x35   :  { %v124_v8 = vsel %vm123_vm6, %v1278_v42, %v121_v24  ;;  %v185_v21 = vrot.slane %v1314_v4, 1  ;;  %v201_v12 = vsel %vm120_vm5, %v1276_v39, %v200_v9  ;;  %v175_v15 = vmul.f32 %v1251_v16, %v160_v10 }
  0x36   :  { %v147_v32 = vmul.f32 %v1251_v16, %v124_v8  ;;  %v202_v17 = vsel %vm123_vm6, %v1282_v47, %v201_v12  ;;  %v205_v19 = vsel %vm111_vm2, %v1286_v49, %v204_v13  ;;  %v241_v20 = vsel %vm114_vm3, %v1261_v27, %v1226_v5 }
  0x37   :  { %v218_v22 = vmul.f32 %v1251_v16, %v202_v17  ;;  %v1349_v25 = vmul.f32 %v1257_v40, %v205_v19  ;;  %v242_v37 = vsel %vm117_vm4, %v1269_v33, %v241_v20  ;;  %v245_v35 = vsel %vm105_vm0, %v1284_v48, %v1282_v47 }
  0x38   :  { %v184_v45 = vrot.slane %v175_v15, 1  ;;  %v243_v50 = vsel %vm120_vm5, %v1274_v38, %v242_v37  ;;  %v246_v51 = vsel %vm108_vm1, %v1278_v42, %v245_v35  ;;  %v284_v53 = vsel %vm117_vm4, %v1261_v27, %v1226_v5 }
  0x39   :  { %v227_v54 = vrot.slane %v218_v22, 2  ;;  %v228_v56 = vrot.slane %v1349_v25, 2  ;;  %v244_v59 = vsel %vm123_vm6, %v1276_v39, %v243_v50  ;;  %v247_v60 = vsel %vm111_vm2, %v1259_v43, %v246_v51 }
  0x3a   :  { %v186_v63 = vsel %vm183_vm7, %v184_v45, %v185_v21  ;;  %v248_v0 = vsel %vm114_vm3, %v1286_v49, %v247_v60  ;;  %v261_v24 = vmul.f32 %v1251_v16, %v244_v59  ;;  %v285_v28 = vsel %vm120_vm5, %v1269_v33, %v284_v53 }
  0x3b   :  { %v194_v6 = vadd.f32 %v186_v63, %v147_v32  ;;  %v229_v7 = vsel %vm226_vm8, %v227_v54, %v228_v56  ;;  %v1380_v8 = vmul.f32 %v1257_v40, %v248_v0  ;;  %v286_v18 = vsel %vm123_vm6, %v1274_v38, %v285_v28 }
  0x3c   :  { %v270_v9 = vrot.slane %v261_v24, 3  ;;  %v287_v10 = vsel %vm105_vm0, %v1282_v47, %v1276_v39  ;;  %v304_v12 = vmul.f32 %v1251_v16, %v286_v18  ;;  %v327_v32 = vsel %vm120_vm5, %v1261_v27, %v1226_v5  ;;  %v447_v18 = vld [vmem:[%s1565_s3] sm:$0xf] }
  0x3d   :  { %v361_v13 = vsel %vm355_vm11, %v359_v11, %v360_v55  ;;  %v271_v15 = vrot.slane %v1380_v8, 3  ;;  %v288_v17 = vsel %vm108_vm1, %v1284_v48, %v287_v10  ;;  %v328_v19 = vsel %vm123_vm6, %v1269_v33, %v327_v32 }
  0x3e   :  { %v403_v20 = vrot.slane %v1307_v62, 6  ;;  %v237_v22 = vadd.f32 %v229_v7, %v194_v6  ;;  %v289_v37 = vsel %vm111_vm2, %v1278_v42, %v288_v17  ;;  %v329_v58 = vsel %vm105_vm0, %v1276_v39, %v1274_v38 }
  0x3f   :  { %v272_v11 = vsel %vm269_vm9, %v270_v9, %v271_v15  ;;  %v290_v35 = vsel %vm114_vm3, %v1259_v43, %v289_v37  ;;  %v330_v45 = vsel %vm108_vm1, %v1282_v47, %v329_v58  ;;  %v347_v50 = vmul.f32 %v1251_v16, %v328_v19 }
  0x40   :  { %v368_v51 = vadd.f32 %v361_v13, %v1255_v26  ;;  %v291_v53 = vsel %vm117_vm4, %v1286_v49, %v290_v35  ;;  %v313_v54 = vrot.slane %v304_v12, 4  ;;  %v331_v59 = vsel %vm111_vm2, %v1284_v48, %v330_v45 }
  0x41   :  { %v305_v60 = vmul.f32 %v1257_v40, %v291_v53  ;;  %v332_v63 = vsel %vm114_vm3, %v1278_v42, %v331_v59  ;;  %v370_v0 = vsel %vm123_vm6, %v1261_v27, %v1226_v5  ;;  %v371_v26 = vsel %vm105_vm0, %v1274_v38, %v1269_v33 }
  0x42   :  { %v404_v24 = vsel %vm398_vm12, %v402_v31, %v403_v20  ;;  %v280_v28 = vadd.f32 %v272_v11, %v237_v22  ;;  %v333_v6 = vsel %vm117_vm4, %v1259_v43, %v332_v63  ;;  %v372_v7 = vsel %vm108_vm1, %v1276_v39, %v371_v26 }
  0x43   :  { %v314_v8 = vrot.slane %v305_v60, 4  ;;  %v334_v5 = vsel %vm120_vm5, %v1286_v49, %v333_v6  ;;  %v356_v27 = vrot.slane %v347_v50, 5  ;;  %v373_v33 = vsel %vm111_vm2, %v1282_v47, %v372_v7 }
  0x44   :  { %v348_v38 = vmul.f32 %v1257_v40, %v334_v5  ;;  %v374_v36 = vsel %vm114_vm3, %v1284_v48, %v373_v33  ;;  %v390_v31 = vmul.f32 %v1251_v16, %v370_v0  ;;  %v126_v39 = vsel %vm105_vm0, %v1286_v49, %v1259_v43 }
  0x45   :  { %v411_v9 = vadd.f32 %v404_v24, %v368_v51  ;;  %v315_v10 = vsel %vm312_vm10, %v313_v54, %v314_v8  ;;  %v375_v47 = vsel %vm117_vm4, %v1278_v42, %v374_v36  ;;  %v148_v12 = vmul.f32 %v1257_v40, %v126_v39 }
  0x46   :  { %v323_v48 = vadd.f32 %v315_v10, %v280_v28  ;;  %v357_v13 = vrot.slane %v348_v38, 5  ;;  %v376_v16 = vsel %vm120_vm5, %v1259_v43, %v375_v47  ;;  %v142_v17 = vsel %vm105_vm0, %v1076_v41, %v1060_v34 }
  0x47   :  { %v377_v22 = vsel %vm123_vm6, %v1286_v49, %v376_v16  ;;  %v448_v37 = vperm.slane %v447_v18, 0  ;;  %v195_v42 = vadd.f32 %v185_v21, %v148_v12  ;;  %v399_v45 = vrot.slane %v390_v31, 6 }
  0x48   :  { %v358_v11 = vsel %vm355_vm11, %v356_v27, %v357_v13  ;;  %v391_v35 = vmul.f32 %v1257_v40, %v377_v22  ;;  %v150_v43 = vmul.f32 %v1082_v44, %v142_v17  ;;  %v467_v54 = vperm.slane %v447_v18, 1 }
  0x49   :  { %v366_v51 = vadd.f32 %v358_v11, %v323_v48  ;;  %v238_v34 = vadd.f32 %v228_v56, %v195_v42  ;;  %v484_v56 = vperm.slane %v447_v18, 2  ;;  %v501_v33 = vperm.slane %v447_v18, 3 }
  0x4a   :  { %v400_v41 = vrot.slane %v391_v35, 6  ;;  %v197_v49 = vadd.f32 %v188_v3, %v150_v43  ;;  %v522_v42 = vrot.slane %v1021_v2, 3  ;;  %vm659_vm7 = vcmask 74752  }
  0x4b   :  { %v281_v53 = vadd.f32 %v271_v15, %v238_v34  ;;  %vm684_vm8 = vcmask 80896  }
  0x4c   :  { %v401_v40 = vsel %vm398_vm12, %v399_v45, %v400_v41  ;;  %v240_v44 = vadd.f32 %v231_v23, %v197_v49  ;;  %v526_v11 = vperm.slane %v522_v42, 0 }
  0x4d   :  { %v409_v59 = vadd.f32 %v401_v40, %v366_v51  ;;  %v324_v25 = vadd.f32 %v314_v8, %v281_v53 }
  0x4e   :  { %v283_v57 = vadd.f32 %v274_v46, %v240_v44 }
  0x4f   :  { %v367_v26 = vadd.f32 %v357_v13, %v324_v25 }
  0x50   :  { %v326_v6 = vadd.f32 %v317_v61, %v283_v57 }
  0x51   :  { %v410_v14 = vadd.f32 %v400_v41, %v367_v26 }
  0x52   :  { %v369_v27 = vadd.f32 %v360_v55, %v326_v6 }
  0x54   :  { %v412_v61 = vadd.f32 %v403_v20, %v369_v27 }
  0x60   :  { %v529_v43 = vpop.permute.xlu2 %528 }
  0x68   :  { %v537_v51 = vpop.permute.xlu2 %536 }
  0x81   :  { %v432_v32 = vpop.permute.xlu1 %431  ;;  %v419_v58 = vpop.permute.xlu0 %418 }
  0x82   :  { %v441_v19 = vmul.f32 0.14285715, %v432_v32  ;;  %v439_v4 = vmul.f32 0.14285715, %v419_v58 }
  0x84   :  { %v1466_v50 = vmul.f32 %v441_v19, %v411_v9  ;;  %v443_v63 = vmul.f32 %v439_v4, %v409_v59 }
  0x86   :  { %v451_v21 = vmul.f32 %v448_v37, %v1466_v50  ;;  %v468_v3 = vmul.f32 %v467_v54, %v443_v63  ;;  %v449_v0 = vmul.f32 %v448_v37, %v443_v63  ;;  %v485_v15 = vmul.f32 %v484_v56, %v443_v63 }
  0x87   :  { %v470_v46 = vmul.f32 %v467_v54, %v1466_v50  ;;  %v487_v8 = vmul.f32 %v484_v56, %v1466_v50  ;;  %v502_v18 = vmul.f32 %v501_v33, %v443_v63 }
  0x88   :  { %v461_v60 = vsel %vm453_vm13, %v451_v21, 0.0  ;;  %v472_v24 = vsel %vm453_vm13, %v468_v3, 0.0  ;;  %v454_v28 = vsel %vm453_vm13, %v449_v0, 0.0  ;;  %v489_v23 = vsel %vm453_vm13, %v485_v15, 0.0 }
  0x89   :  { %462 = vadd.xlane.f32.xlu1 %v461_v60  ;;  %473 = vadd.xlane.f32.xlu0 %v472_v24  ;;  %v478_v36 = vsel %vm453_vm13, %v470_v46, 0.0  ;;  %v495_v52 = vsel %vm453_vm13, %v487_v8, 0.0  ;;  %v506_v47 = vsel %vm453_vm13, %v502_v18, 0.0 }
  0x8a   :  { %455 = vadd.xlane.f32.xlu2 %v454_v28 }
  0x91   :  { %v425_v7 = vpop.permute.xlu0 %424  ;;  %490 = vadd.xlane.f32.xlu1 %v489_v23  ;;  %v438_v38 = vpop.permute.xlu1 %437 }
  0x92   :  { %v440_v30 = vmul.f32 0.14285715, %v425_v7  ;;  %479 = vadd.xlane.f32.xlu2 %v478_v36  ;;  %v442_v39 = vmul.f32 0.14285715, %v438_v38 }
  0x94   :  { %v444_v5 = vmul.f32 %v440_v30, %v410_v14  ;;  %v446_v29 = vmul.f32 %v442_v39, %v412_v61 }
  0x96   :  { %v503_v31 = vmul.f32 %v501_v33, %v444_v5  ;;  %v450_v10 = vmul.f32 %v448_v37, %v444_v5  ;;  %v452_v12 = vmul.f32 %v448_v37, %v446_v29  ;;  %v471_v48 = vmul.f32 %v467_v54, %v446_v29 }
  0x97   :  { %v469_v20 = vmul.f32 %v467_v54, %v444_v5  ;;  %v486_v13 = vmul.f32 %v484_v56, %v444_v5  ;;  %v488_v19 = vmul.f32 %v484_v56, %v446_v29  ;;  %v504_v37 = vmul.f32 %v501_v33, %v1466_v50 }
  0x98   :  { %v509_v9 = vsel %vm457_vm14, %v503_v31, 0.0  ;;  %v458_v55 = vsel %vm457_vm14, %v450_v10, 0.0  ;;  %v464_v32 = vsel %vm457_vm14, %v452_v12, 0.0  ;;  %v481_v62 = vsel %vm457_vm14, %v471_v48, 0.0 }
  0x99   :  { %496 = vadd.xlane.f32.xlu1 %v495_v52  ;;  %510 = vadd.xlane.f32.xlu0 %v509_v9  ;;  %v475_v16 = vsel %vm457_vm14, %v469_v20, 0.0  ;;  %v492_v17 = vsel %vm457_vm14, %v486_v13, 0.0  ;;  %v498_v22 = vsel %vm457_vm14, %v488_v19, 0.0  ;;  %v512_v58 = vsel %vm453_vm13, %v504_v37, 0.0 }
  0x9a   :  { %459 = vadd.xlane.f32.xlu2 %v458_v55  ;;  %v505_v35 = vmul.f32 %v501_v33, %v446_v29  ;;  %v533_v49 = vpop.permute.xlu0 %532  ;;  %v926_v33 = vld [vmem:[#allocation2] ss:$0 sm:$0xff]  ;;  %v1505_v9 = vand.u32 127, %v414_v1 }
  0x9c   :  { %v515_v45 = vsel %vm457_vm14, %v505_v35, 0.0  ;;  %v626_v10 = vadd.s32 4294967288, %v1505_v9 }
  0xa1   :  { %507 = vadd.xlane.f32.xlu1 %v506_v47 }
  0xa2   :  { %465 = vadd.xlane.f32.xlu2 %v464_v32 }
  0xa9   :  { %482 = vadd.xlane.f32.xlu1 %v481_v62 }
  0xaa   :  { %476 = vadd.xlane.f32.xlu2 %v475_v16  ;;  %v673_v16 = vld [vmem:[%s1567_s5 + $0x8] sm:$0x3] }
  0xab   :  { %852 = vmatpush.msk.msra.mxu0 %vm398_vm12, %v673_v16 }
  0xb1   :  { %493 = vadd.xlane.f32.xlu1 %v492_v17  ;;  %v672_v17 = vld [vmem:[%s1567_s5] sm:$0xff] }
  0xb2   :  { %705 = vmatpush.msra.mxu0 %v672_v17 }
  0xb9   :  { %499 = vadd.xlane.f32.xlu1 %v498_v22 }
  0xc1   :  { %513 = vadd.xlane.f32.xlu1 %v512_v58 }
  0xc2   :  { %540 = vperm.xlu2 %922, %v526_v11  }
  0xc9   :  { %516 = vadd.xlane.f32.xlu1 %v515_v45 }
  0xfc   :  { %v463_v34 = vpop.xlane.xlu1 %462  ;;  %v474_v2 = vpop.xlane.xlu0 %473 }
  0xfd   :  { %v545_v41 = vadd.f32 %v529_v43, %v463_v34  ;;  %v456_v4 = vpop.xlane.xlu2 %455  ;;  %v547_v40 = vadd.f32 %v533_v49, %v474_v2 }
  0xfe   :  { %v543_v21 = vadd.f32 %v529_v43, %v456_v4 }
  0xff   :  { %582 = vperm.xlu2 %922, %v545_v41  }
 0x100   :  { %576 = vperm.xlu1 %925, %v543_v21  }
 0x104   :  { %v491_v50 = vpop.xlane.xlu1 %490 }
 0x105   :  { %v480_v53 = vpop.xlane.xlu2 %479  ;;  %v551_v25 = vadd.f32 %v537_v51, %v491_v50 }
 0x106   :  { %v549_v54 = vadd.f32 %v533_v49, %v480_v53 }
 0x108   :  { %588 = vperm.xlu1 %925, %v547_v40   ;;  %594 = vperm.xlu2 %922, %v549_v54  }
 0x10c   :  { %v497_v44 = vpop.xlane.xlu1 %496  ;;  %v511_v28 = vpop.xlane.xlu0 %510 }
 0x10d   :  { %v553_v59 = vadd.f32 %v537_v51, %v497_v44  ;;  %v460_v60 = vpop.xlane.xlu2 %459 }
 0x10e   :  { %v544_v57 = vadd.f32 %v529_v43, %v460_v60 }
 0x10f   :  { %606 = vperm.xlu0 %923, %v553_v59  }
 0x110   :  { %600 = vperm.xlu2 %922, %v551_v25  }
 0x114   :  { %v508_v56 = vpop.xlane.xlu1 %507 }
 0x115   :  { %v466_v63 = vpop.xlane.xlu2 %465 }
 0x116   :  { %v546_v26 = vadd.f32 %v529_v43, %v466_v63 }
 0x118   :  { %579 = vperm.xlu2 %922, %v544_v57  }
 0x11c   :  { %v483_v3 = vpop.xlane.xlu1 %482 }
 0x11d   :  { %v477_v0 = vpop.xlane.xlu2 %476  ;;  %v550_v46 = vadd.f32 %v533_v49, %v483_v3 }
 0x11e   :  { %v548_v15 = vadd.f32 %v533_v49, %v477_v0 }
 0x120   :  { %585 = vperm.xlu2 %922, %v546_v26   ;;  %591 = vperm.xlu0 %923, %v548_v15  }
 0x124   :  { %v494_v24 = vpop.xlane.xlu1 %493 }
 0x125   :  { %v541_v14 = vpop.permute.xlu2 %540  ;;  %v552_v27 = vadd.f32 %v537_v51, %v494_v24 }
 0x126   :  { %v556_v23 = vadd.f32 %v541_v14, %v511_v28  ;;  %v555_v6 = vadd.f32 %v541_v14, %v508_v56 }
 0x128   :  { %615 = vperm.xlu0 %923, %v556_v23   ;;  %612 = vperm.xlu1 %925, %v555_v6  }
 0x12c   :  { %v500_v7 = vpop.xlane.xlu1 %499 }
 0x12d   :  { %v554_v30 = vadd.f32 %v537_v51, %v500_v7 }
 0x12f   :  { %609 = vperm.xlu2 %922, %v554_v30  }
 0x130   :  { %597 = vperm.xlu1 %925, %v550_v46  }
 0x134   :  { %v514_v8 = vpop.xlane.xlu1 %513 }
 0x135   :  { %v557_v5 = vadd.f32 %v541_v14, %v514_v8  ;;  %v927_v8 = vld [vmem:[%s1568_s6] ss:$0 sm:$0xff]  ;;  %s964_s6 = smov [#allocation3]  }
 0x137   :  { %618 = vperm.xlu2 %922, %v557_v5  }
 0x138   :  { %603 = vperm.xlu1 %925, %v552_v27  }
 0x13c   :  { %v517_v38 = vpop.xlane.xlu1 %516 }
 0x13d   :  { %v558_v36 = vadd.f32 %v541_v14, %v517_v38 }
 0x13f   :  { %744 = vperm.xlu2 %922, %v926_v33   ;;  %v928_v33 = vld [vmem:[%s1569_s7] ss:$0 sm:$0xff]  ;;  %s841_s7 = sshll.u32 %s964_s6, 4  ;;  %s842_s7 = int_to_ptr.vmem [resolvable:$true] %s841_s7 }
 0x140   :  { %621 = vperm.xlu1 %925, %v558_v36  }
 0x159   :  { %v583_v31 = vpop.permute.xlu2 %582 }
 0x15a   :  { %v630_v12 = vperm.slane %v583_v31, %v1505_v9 }
 0x162   :  { %v595_v52 = vpop.permute.xlu2 %594 }
 0x163   :  { %v636_v11 = vperm.slane %v595_v52, %v1505_v9  ;;  %v960_v52 = vmov 269488144  }
 0x16a   :  { %v601_v61 = vpop.permute.xlu2 %600 }
 0x16b   :  { %v639_v50 = vperm.slane %v601_v61, %v1505_v9  ;;  %v721_v61 = vunpack.c.l.s4 %v960_v52 }
 0x172   :  { %v580_v39 = vpop.permute.xlu2 %579  ;;  %v577_v29 = vpop.permute.xlu1 %576 }
 0x173   :  { %v625_v55 = vperm.slane %v577_v29, %v1505_v9  ;;  %v627_v18 = vperm.slane %v580_v39, %v626_v10  ;;  %v961_v39 = vmov 842150450  }
 0x175   :  { %v629_v48 = vsel %vm628_vm15, %v627_v18, %v625_v55  ;;  %v722_v55 = vunpack.c.0.s8 %v721_v61 }
 0x17a   :  { %v586_v47 = vpop.permute.xlu2 %585  ;;  %v589_v13 = vpop.permute.xlu1 %588 }
 0x17b   :  { %v631_v32 = vperm.slane %v586_v47, %v626_v10  ;;  %v633_v35 = vperm.slane %v589_v13, %v1505_v9  ;;  %v962_v47 = vmov 1987475062  }
 0x17d   :  { %v632_v62 = vsel %vm628_vm15, %v631_v32, %v630_v12  ;;  %v733_v12 = vunpack.c.l.s4 %v962_v47  ;;  %v963_v32 = vmov 1414812756  }
 0x17e   :  { %v651_v20 = vsel %vm105_vm0, %v632_v62, %v629_v48  ;;  %v729_v48 = vunpack.c.l.s4 %v963_v32 }
 0x17f   :  { %v660_v1 = vsel %vm659_vm7, %v651_v20, 0.0  ;;  %v734_v13 = vunpack.c.0.s8 %v733_v12 }
 0x180   :  { %661 = vadd.xlane.f32.xlu1 %v660_v1 }
 0x181   :  { %v607_v19 = vpop.permute.xlu0 %606 }
 0x182   :  { %v642_v2 = vperm.slane %v607_v19, %v1505_v9  ;;  %v730_v19 = vunpack.c.0.s8 %v729_v48 }
 0x189   :  { %v610_v34 = vpop.permute.xlu2 %609 }
 0x18a   :  { %v643_v4 = vperm.slane %v610_v34, %v626_v10 }
 0x18c   :  { %v644_v54 = vsel %vm628_vm15, %v643_v4, %v642_v2 }
 0x191   :  { %v619_v57 = vpop.permute.xlu2 %618 }
 0x192   :  { %v592_v37 = vpop.permute.xlu0 %591  ;;  %v648_v24 = vperm.slane %v619_v57, %v1505_v9 }
 0x193   :  { %v634_v42 = vperm.slane %v592_v37, %v626_v10 }
 0x195   :  { %v635_v43 = vsel %vm628_vm15, %v634_v42, %v633_v35 }
 0x196   :  { %v678_v40 = vsel %vm108_vm1, %v635_v43, %v651_v20 }
 0x199   :  { %v745_v29 = vpop.permute.xlu2 %744 }
 0x19a   :  { %v613_v22 = vpop.permute.xlu1 %612  ;;  %v616_v44 = vpop.permute.xlu0 %615 }
 0x19b   :  { %v646_v3 = vperm.slane %v616_v44, %v626_v10  ;;  %v645_v0 = vperm.slane %v613_v22, %v1505_v9 }
 0x19d   :  { %v647_v14 = vsel %vm628_vm15, %v646_v3, %v645_v0 }
 0x1a2   :  { %v598_v58 = vpop.permute.xlu1 %597 }
 0x1a3   :  { %v637_v45 = vperm.slane %v598_v58, %v626_v10 }
 0x1a5   :  { %v638_v51 = vsel %vm628_vm15, %v637_v45, %v636_v11 }
 0x1a6   :  { %v652_v41 = vsel %vm105_vm0, %v638_v51, %v635_v43  ;;  %v679_v59 = vsel %vm111_vm2, %v638_v51, %v678_v40 }
 0x1a7   :  { %v663_v49 = vsel %vm659_vm7, %v652_v41, 0.0 }
 0x1a8   :  { %664 = vadd.xlane.f32.xlu2 %v663_v49 }
 0x1aa   :  { %v604_v21 = vpop.permute.xlu1 %603 }
 0x1ab   :  { %v640_v53 = vperm.slane %v604_v21, %v626_v10 }
 0x1ad   :  { %v641_v60 = vsel %vm628_vm15, %v640_v53, %v639_v50 }
 0x1ae   :  { %v680_v25 = vsel %vm114_vm3, %v641_v60, %v679_v59  ;;  %v653_v56 = vsel %vm105_vm0, %v644_v54, %v641_v60  ;;  %vm820_vm3 = vcmask 25600  }
 0x1af   :  { %v666_v63 = vsel %vm659_vm7, %v653_v56, 0.0  ;;  %v681_v15 = vsel %vm117_vm4, %v644_v54, %v680_v25 }
 0x1b0   :  { %v682_v6 = vsel %vm120_vm5, %v647_v14, %v681_v15 }
 0x1b2   :  { %v622_v26 = vpop.permute.xlu1 %621 }
 0x1b3   :  { %v649_v28 = vperm.slane %v622_v26, %v626_v10  ;;  %v725_v10 = vunpack.c.l.s4 %v961_v39 }
 0x1b5   :  { %v650_v23 = vsel %vm628_vm15, %v649_v28, %v648_v24  ;;  %v726_v18 = vunpack.c.0.s8 %v725_v10 }
 0x1b6   :  { %v683_v7 = vsel %vm123_vm6, %v650_v23, %v682_v6  ;;  %v654_v30 = vsel %vm105_vm0, %v650_v23, %v647_v14 }
 0x1b7   :  { %853 = vmatmul.msk.f32.vlgmr.msra.gmra.mxu0 %vm684_vm8, %v683_v7  ;;  %v669_v46 = vsel %vm659_vm7, %v654_v30, 0.0 }
 0x1b8   :  { %670 = vadd.xlane.f32.xlu1 %v669_v46 }
 0x1f3   :  { %v662_v22 = vpop.xlane.xlu1 %661 }
 0x21b   :  { %v665_v37 = vpop.xlane.xlu2 %664 }
 0x22b   :  { %v671_v34 = vpop.xlane.xlu1 %670 }
 0x234   :  { %v707_v5 = vpop.f32.mrf.mxu0 }
 0x235   :  { %v708_v27 = vadd.f32 %v927_v8, %v707_v5 }
 0x237   :  { %v710_v38 = vmax.f32 %v708_v27, 0.0 }
 0x239   :  { %v715_v36 = vmul.f32 %v928_v33, %v710_v38 }
 0x23b   :  { %v716_v31 = vsel %vm453_vm13, %v715_v36, 0.0 }
 0x23c   :  { %717 = vadd.xlane.f32.xlu0 %v716_v31 }
 0x244   :  { %667 = vadd.xlane.f32.xlu0 %v666_v63 }
 0x2af   :  { %v718_v62 = vpop.xlane.xlu0 %717 }
 0x2b0   :  { %v723_v20 = vperm.slane %v718_v62, %v722_v55  ;;  %v727_v1 = vperm.slane %v718_v62, %v726_v18  ;;  %v735_v11 = vperm.slane %v718_v62, %v734_v13  ;;  %v731_v35 = vperm.slane %v718_v62, %v730_v19 }
 0x2b2   :  { %v747_v16 = vadd.f32 %v745_v29, %v723_v20  ;;  %v748_v17 = vadd.f32 %v745_v29, %v727_v1  ;;  %v750_v45 = vadd.f32 %v745_v29, %v735_v11  ;;  %v749_v51 = vadd.f32 %v745_v29, %v731_v35 }
 0x2b4   :  { %v751_v42 = vadd.f32 %v747_v16, %v662_v22  ;;  %v752_v58 = vadd.f32 %v748_v17, %v665_v37  ;;  %v754_v4 = vadd.f32 %v750_v45, %v671_v34 }
 0x2b6   :  { %759 = vst [vmem:[#allocation1] ss:$4 sm:$0xff] %v751_v42 }
 0x2b7   :  { %762 = vst [vmem:[#allocation1 + $0x20] ss:$4 sm:$0xff] %v752_v58  ;;  %v668_v43 = vpop.xlane.xlu0 %667 }
 0x2b8   :  { %v753_v41 = vadd.f32 %v749_v51, %v668_v43 }
 0x2bd   :  { %v760_v49 = vld.sshfl [vmem:[#allocation1] sm:$0xff pattern:$0x73625140] }
 0x2be   :  { %769 = vperm.xlu0 %923, %v760_v49   ;;  %764 = vst [vmem:[#allocation1] ss:$4 sm:$0xff] %v753_v41  ;;  %v763_v21 = vld.sshfl [vmem:[#allocation1 + $0x20] sm:$0xff pattern:$0x73625140] }
 0x2bf   :  { %772 = vperm.xlu2 %922, %v763_v21   ;;  %766 = vst [vmem:[#allocation1 + $0x20] ss:$4 sm:$0xff] %v754_v4 }
 0x2c5   :  { %v765_v50 = vld.sshfl [vmem:[#allocation1] sm:$0xff pattern:$0x73625140] }
 0x2c6   :  { %775 = vperm.xlu1 %925, %v765_v50   ;;  %v767_v2 = vld.sshfl [vmem:[#allocation1 + $0x20] sm:$0xff pattern:$0x73625140] }
 0x2c7   :  { %778 = vperm.xlu0 %923, %v767_v2  }
 0x319   :  { %v773_v40 = vpop.permute.xlu2 %772 }
 0x31a   :  { %v781_v44 = vperm.slane %v773_v40, %v1505_v9 }
 0x330   :  { %v770_v53 = vpop.permute.xlu0 %769 }
 0x331   :  { %v780_v54 = vperm.slane %v770_v53, %v1505_v9 }
 0x333   :  { %v784_v56 = vsel %vm105_vm0, %v781_v44, %v780_v54  ;;  %vm833_vm0 = vcmask 31744  }
 0x338   :  { %v776_v59 = vpop.permute.xlu1 %775 }
 0x339   :  { %v782_v60 = vperm.slane %v776_v59, %v1505_v9  ;;  %v779_v25 = vpop.permute.xlu0 %778 }
 0x33a   :  { %v783_v63 = vperm.slane %v779_v25, %v1505_v9 }
 0x33b   :  { %v785_v57 = vsel %vm108_vm1, %v782_v60, %v784_v56 }
 0x33c   :  { %v786_v3 = vsel %vm111_vm2, %v783_v63, %v785_v57 }
 0x33d   :  { %788 = vxpose.xlu2.b32.start.end [1/1] (short) (narrow) %v786_v3, 8 }
 0x3d6   :  { %v804_v0 = vpop.trf.xlu2 }
 0x3d7   :  { %v821_v26 = vsel %vm820_vm3, %v804_v0, -inf }
 0x3d8   :  { %822 = vmax.xlane.f32.xlu0 %v821_v26 }
 0x44b   :  { %v823_v15 = vpop.xlane.xlu0 %822 }
 0x44c   :  { %v824_v24 = vsub.f32 %v804_v0, %v823_v15 }
 0x44e   :  { %v825_v28 = vmul.f32 1.442695, %v824_v24 }
 0x450   :  { %929 = vpow2.f32 %v825_v28 }
 0x456   :  { %v930_v14 = vpop.eup %929 }
 0x457   :  { %v827_v23 = vsel %vm820_vm3, %v930_v14, 0.0 }
 0x458   :  { %828 = vadd.xlane.f32.xlu1 %v827_v23 }
 0x4cb   :  { %v829_v6 = vpop.xlane.xlu1 %828 }
 0x4cc   :  { %931 = vlog2.f32 %v829_v6 }
 0x4d2   :  { %v932_v7 = vpop.eup %931 }
 0x4d3   :  { %v831_v9 = vmul.f32 0.6931472, %v932_v7 }
 0x4d5   :  { %v832_v30 = vsub.f32 %v824_v24, %v831_v9 }
 0x4d7   :  { %v834_v46 = vsel %vm833_vm0, %v832_v30, 0.0 }
 0x4d8   :  { %835 = vst [vmem:[#allocation3] sm:$0x3] %v834_v46 }
 0x4d9   :  { %846 = dma.vmem_to_hbm [thread:$0]  %s842_s7, 32, %s844_s20, [#allocation4]  }
 0x4da   :  { %957 = dma.done.wait [#allocation4], 32  }
 0x4db   :  { %958 = vsyncadd [#allocation4], 4294967264 }
 0x4dc   :  { %851 = vsyncpa [#allocation4], 1 }

</bundles_post_ra>
